<compile_context>
chip_gen: v7x
topology: tpu7x:2x2x1
jax: 0.10.0
libtpu: 0.0.40
codegen_flags: <defaults>
</compile_context>

<pallas_src>
import functools
import math

import jax
import jax.numpy as jnp
from jax.experimental import pallas as pl
from jax.experimental.pallas import tpu as pltpu


# ---------------------------------------------------------------------------
# helpers
# ---------------------------------------------------------------------------
_VMEM_LIMIT_BYTES = 48 * 1024 * 1024  # below v7x's 64 MiB/core, above defaults


def _cparams(*sem):
    return pltpu.CompilerParams(dimension_semantics=sem,
                                vmem_limit_bytes=_VMEM_LIMIT_BYTES)


def _row_blocks(n, target=256):
    """Return (n_pad, tile). Tile is a multiple of 8 (or the full extent for
    small n); if n has no suitable divisor the rows are padded to a multiple
    of the tile instead of falling back to a whole-array block."""
    if n <= target:
        return n, n
    t = (target // 8) * 8
    while t >= 8:
        if n % t == 0:
            return n, t
        t -= 8
    t = (target // 8) * 8
    n_pad = ((n + t - 1) // t) * t
    return n_pad, t


def _k_tile(kdim, target=512):
    """Reduction tile for the FFN hidden dim: 128-aligned divisor <= target."""
    if kdim <= target:
        return kdim
    t = (target // 128) * 128
    while t >= 128:
        if kdim % t == 0:
            return t
        t -= 128
    t = (target // 8) * 8
    while t >= 8:
        if kdim % t == 0:
            return t
        t -= 8
    return kdim


def _heads_per_group(nhead, hd, max_cols=512):
    """Heads per attention grid step: group so G*hd is lane-dense (mult of
    128) and bounded, or take all heads when d_model is small."""
    d_model = nhead * hd
    if d_model <= max_cols:
        return nhead
    best = None
    for g in range(1, nhead + 1):
        if nhead % g:
            continue
        ghd = g * hd
        if ghd <= max_cols and ghd % 128 == 0:
            best = g
    return best if best is not None else nhead


def _pad_rows(x, n_pad):
    n = x.shape[0]
    if n_pad == n:
        return x
    return jnp.pad(x, ((0, n_pad - n), (0, 0)))


# ---------------------------------------------------------------------------
# kernel 1: fused input-proj + QKV projection
#   sp  = x @ Wp + bp
#   qkv = sp @ [Wq|Wk|Wv] + [bq|bk|bv]   -> split into q, k, v outputs
# ---------------------------------------------------------------------------
def _proj_qkv_kernel(x_ref, wp_ref, bp_ref, wqkv_ref, bqkv_ref,
                     sp_ref, q_ref, k_ref, v_ref):
    x = x_ref[...]
    sp = jnp.dot(x, wp_ref[...], preferred_element_type=jnp.float32)
    sp = sp + bp_ref[...].astype(jnp.float32)
    sp_ref[...] = sp.astype(sp_ref.dtype)

    qkv = jnp.dot(sp.astype(wqkv_ref.dtype), wqkv_ref[...],
                  preferred_element_type=jnp.float32)
    qkv = qkv + bqkv_ref[...].astype(jnp.float32)
    d = q_ref.shape[-1]
    q_ref[...] = qkv[:, :d].astype(q_ref.dtype)
    k_ref[...] = qkv[:, d:2 * d].astype(k_ref.dtype)
    v_ref[...] = qkv[:, 2 * d:].astype(v_ref.dtype)


def fused_proj_qkv(x, wp, bp, wqkv, bqkv, *, block_rows=256):
    n, dim_in = x.shape
    d_model = wp.shape[1]
    n_pad, tn = _row_blocks(n, block_rows)
    xp = _pad_rows(x, n_pad)

    row_out = pl.BlockSpec((tn, d_model), lambda i: (i, 0))
    outs = pl.pallas_call(
        _proj_qkv_kernel,
        out_shape=tuple(jax.ShapeDtypeStruct((n_pad, d_model), x.dtype)
                        for _ in range(4)),
        grid=(n_pad // tn,),
        in_specs=[
            pl.BlockSpec((tn, dim_in), lambda i: (i, 0)),
            pl.BlockSpec((dim_in, d_model), lambda i: (0, 0)),
            pl.BlockSpec((1, d_model), lambda i: (0, 0)),
            pl.BlockSpec((d_model, 3 * d_model), lambda i: (0, 0)),
            pl.BlockSpec((1, 3 * d_model), lambda i: (0, 0)),
        ],
        out_specs=(row_out, row_out, row_out, row_out),
        compiler_params=_cparams("parallel"),
    )(xp, wp, bp.reshape(1, -1), wqkv, bqkv.reshape(1, -1))
    sp, q, k, v = outs
    if n_pad != n:
        sp, q, k, v = (t[:n] for t in (sp, q, k, v))
    return sp, q, k, v


# ---------------------------------------------------------------------------
# kernel 2: self-attention; grid over (batch, head-group); head split is done
# by column slicing inside the kernel (no HBM transposes).
# ---------------------------------------------------------------------------
def _attention_kernel(q_ref, k_ref, v_ref, o_ref, *, heads, hd, scale):
    for h in range(heads):          # static unroll over heads in this block
        lo = h * hd
        q = q_ref[0, :, lo:lo + hd].astype(jnp.float32) * scale
        k = k_ref[0, :, lo:lo + hd].astype(jnp.float32)
        v = v_ref[0, :, lo:lo + hd].astype(jnp.float32)
        # scores = q @ k^T without an explicit transpose (contract last dims)
        s = jax.lax.dot_general(q, k, (((1,), (1,)), ((), ())),
                                preferred_element_type=jnp.float32)
        m = jnp.max(s, axis=-1, keepdims=True)
        p = jnp.exp(s - m)
        p = p * pl.reciprocal(jnp.sum(p, axis=-1, keepdims=True), approx=True)
        o = jnp.dot(p, v, preferred_element_type=jnp.float32)
        o_ref[0, :, lo:lo + hd] = o.astype(o_ref.dtype)


def attention(q, k, v, batch, seq, nhead):
    # TODO(synk): flash-style KV tiling (online softmax over a KV grid axis)
    # for long sequences where the (S, S) score matrix would not fit VMEM.
    n, d_model = q.shape
    hd = d_model // nhead
    g_heads = _heads_per_group(nhead, hd)
    ghd = g_heads * hd
    n_groups = nhead // g_heads

    q3 = q.reshape(batch, seq, d_model)   # free: rows are batch-major
    k3 = k.reshape(batch, seq, d_model)
    v3 = v.reshape(batch, seq, d_model)

    spec = pl.BlockSpec((1, seq, ghd), lambda bi, gi: (bi, 0, gi))
    out = pl.pallas_call(
        functools.partial(_attention_kernel, heads=g_heads, hd=hd,
                          scale=1.0 / math.sqrt(hd)),
        out_shape=jax.ShapeDtypeStruct((batch, seq, d_model), q.dtype),
        grid=(batch, n_groups),
        in_specs=[spec, spec, spec],
        out_specs=spec,
        compiler_params=_cparams("parallel", "parallel"),
    )(q3, k3, v3)
    return out.reshape(n, d_model)


# ---------------------------------------------------------------------------
# kernel 3: out-proj + NaN->0 + residual add + LayerNorm1 (fused epilogue)
# ---------------------------------------------------------------------------
def _attnout_ln_kernel(a_ref, res_ref, wo_ref, bo_ref, g_ref, b_ref, o_ref,
                       *, eps):
    a = a_ref[...]
    src2 = jnp.dot(a, wo_ref[...], preferred_element_type=jnp.float32)
    src2 = src2 + bo_ref[...].astype(jnp.float32)
    src2 = jnp.where(jnp.isnan(src2), 0.0, src2)
    h = res_ref[...].astype(jnp.float32) + src2
    mean = jnp.mean(h, axis=-1, keepdims=True)
    c = h - mean
    var = jnp.mean(c * c, axis=-1, keepdims=True)
    o_ref[...] = (c * jax.lax.rsqrt(var + eps) * g_ref[...].astype(jnp.float32)
                  + b_ref[...].astype(jnp.float32)).astype(o_ref.dtype)


def attnout_add_ln(a, res, wo, bo, gamma, beta, *, eps=1e-5, block_rows=256):
    n, d_model = a.shape
    n_pad, tn = _row_blocks(n, block_rows)
    ap, rp = _pad_rows(a, n_pad), _pad_rows(res, n_pad)

    row = pl.BlockSpec((tn, d_model), lambda i: (i, 0))
    vec = pl.BlockSpec((1, d_model), lambda i: (0, 0))
    out = pl.pallas_call(
        functools.partial(_attnout_ln_kernel, eps=eps),
        out_shape=jax.ShapeDtypeStruct((n_pad, d_model), a.dtype),
        grid=(n_pad // tn,),
        in_specs=[row, row,
                  pl.BlockSpec((d_model, d_model), lambda i: (0, 0)),
                  vec, vec, vec],
        out_specs=row,
        compiler_params=_cparams("parallel"),
    )(ap, rp, wo, bo.reshape(1, -1), gamma.reshape(1, -1), beta.reshape(1, -1))
    return out[:n] if n_pad != n else out


# ---------------------------------------------------------------------------
# kernel 4: fused FFN (linear1 + ReLU + linear2 over a d_ff reduction grid)
#           + residual add + LayerNorm2; (n, d_ff) intermediate stays in VMEM.
# ---------------------------------------------------------------------------
def _ffn_ln_kernel(x_ref, w1_ref, b1_ref, w2_ref, b2_ref, g_ref, b_ref,
                   o_ref, acc_ref, *, eps):
    kf = pl.program_id(1)

    @pl.when(kf == 0)
    def _():
        acc_ref[...] = jnp.zeros_like(acc_ref)

    x = x_ref[...]
    h = jnp.dot(x, w1_ref[...], preferred_element_type=jnp.float32)
    h = jnp.maximum(h + b1_ref[...].astype(jnp.float32), 0.0)
    acc_ref[...] += jnp.dot(h.astype(w2_ref.dtype), w2_ref[...],
                            preferred_element_type=jnp.float32)

    @pl.when(kf == pl.num_programs(1) - 1)
    def _():
        full = (acc_ref[...] + b2_ref[...].astype(jnp.float32)
                + x_ref[...].astype(jnp.float32))
        mean = jnp.mean(full, axis=-1, keepdims=True)
        c = full - mean
        var = jnp.mean(c * c, axis=-1, keepdims=True)
        o_ref[...] = (c * jax.lax.rsqrt(var + eps)
                      * g_ref[...].astype(jnp.float32)
                      + b_ref[...].astype(jnp.float32)).astype(o_ref.dtype)


def ffn_add_ln(x, w1, b1, w2, b2, gamma, beta, *, eps=1e-5,
               block_rows=256, block_ff=512):
    n, d_model = x.shape
    d_ff = w1.shape[1]
    n_pad, tn = _row_blocks(n, block_rows)
    tkff = _k_tile(d_ff, block_ff)
    xp = _pad_rows(x, n_pad)

    row = pl.BlockSpec((tn, d_model), lambda i, kf: (i, 0))
    vec = pl.BlockSpec((1, d_model), lambda i, kf: (0, 0))
    out = pl.pallas_call(
        functools.partial(_ffn_ln_kernel, eps=eps),
        out_shape=jax.ShapeDtypeStruct((n_pad, d_model), x.dtype),
        grid=(n_pad // tn, d_ff // tkff),
        in_specs=[row,
                  pl.BlockSpec((d_model, tkff), lambda i, kf: (0, kf)),
                  pl.BlockSpec((1, tkff), lambda i, kf: (0, kf)),
                  pl.BlockSpec((tkff, d_model), lambda i, kf: (kf, 0)),
                  vec, vec, vec],
        out_specs=row,
        scratch_shapes=[pltpu.VMEM((tn, d_model), jnp.float32)],
        compiler_params=_cparams("parallel", "arbitrary"),
    )(xp, w1, b1.reshape(1, -1), w2, b2.reshape(1, -1),
      gamma.reshape(1, -1), beta.reshape(1, -1))
    return out[:n] if n_pad != n else out


# ---------------------------------------------------------------------------
# full encoder-layer forward (forward_post path, mode='fixed')
# ---------------------------------------------------------------------------
def transformer_encoder_layer_forward(src, params, *, nhead):
    """src: (S, B, dim_in) seq-major (PyTorch MHA layout) -> (S, B, d_model)."""
    # TODO(synk): dropout/dropout1/dropout2 are identity (eval mode);
    # attn_mask / key_padding_mask / 'relative' mode are not implemented.
    s, b, dim_in = src.shape
    d_model = params["proj_w"].shape[1]
    n = s * b

    # Batch-major rows: subsequent (B*S, d) <-> (B, S, d) reshapes are free,
    # so q/k/v never need an extra HBM transpose for the head split.
    x = src.transpose(1, 0, 2).reshape(n, dim_in)

    # Fused QKV weight (one wide MXU pass instead of three matmuls).
    wqkv = jnp.concatenate([params["wq"], params["wk"], params["wv"]], axis=1)
    bqkv = jnp.concatenate([params["bq"], params["bk"], params["bv"]], axis=0)

    src_p, q, k, v = fused_proj_qkv(x, params["proj_w"], params["proj_b"],
                                    wqkv, bqkv)
    a = attention(q, k, v, b, s, nhead)
    src_n1 = attnout_add_ln(a, src_p, params["wo"], params["bo"],
                            params["ln1_g"], params["ln1_b"])
    out = ffn_add_ln(src_n1, params["w1"], params["b1"],
                     params["w2"], params["b2"],
                     params["ln2_g"], params["ln2_b"])
    return out.reshape(b, s, d_model).transpose(1, 0, 2)


# ---------------------------------------------------------------------------
# pure-JAX reference (for correctness check)
# ---------------------------------------------------------------------------
def reference_forward(src, params, *, nhead, eps=1e-5):
    s, b, _ = src.shape
    d_model = params["proj_w"].shape[1]
    hd = d_model // nhead
    n = s * b
    x = src.reshape(n, -1).astype(jnp.float32)

    def lin(t, w, bias):
        return t @ w.astype(jnp.float32) + bias.astype(jnp.float32)

    sp = lin(x, params["proj_w"], params["proj_b"])
    q = lin(sp, params["wq"], params["bq"])
    k = lin(sp, params["wk"], params["bk"])
    v = lin(sp, params["wv"], params["bv"])

    def to_heads(t):
        return (t.reshape(s, b, nhead, hd)
                 .transpose(1, 2, 0, 3)
                 .reshape(b * nhead, s, hd))

    qh, kh, vh = to_heads(q), to_heads(k), to_heads(v)
    logits = jnp.einsum("hqd,hkd->hqk", qh, kh) / math.sqrt(hd)
    attn = jax.nn.softmax(logits, axis=-1)
    ah = jnp.einsum("hqk,hkd->hqd", attn, vh)
    a = (ah.reshape(b, nhead, s, hd)
           .transpose(2, 0, 1, 3)
           .reshape(n, d_model))
    src2 = lin(a, params["wo"], params["bo"])
    src2 = jnp.where(jnp.isnan(src2), 0.0, src2)

    def layernorm(t, g, bta):
        mu = jnp.mean(t, axis=-1, keepdims=True)
        c = t - mu
        var = jnp.mean(c * c, axis=-1, keepdims=True)
        return c * jax.lax.rsqrt(var + eps) * g + bta

    sp = layernorm(sp + src2, params["ln1_g"], params["ln1_b"])
    ffn = lin(jnp.maximum(lin(sp, params["w1"], params["b1"]), 0.0),
              params["w2"], params["b2"])
    out = layernorm(sp + ffn, params["ln2_g"], params["ln2_b"])
    return out.reshape(s, b, d_model)


def init_params(key, dim_in, d_model, dim_feedforward, dtype=jnp.float32):
    ks = iter(jax.random.split(key, 24))

    def w(shape):
        fan_in = shape[0]
        return (jax.random.normal(next(ks), shape, jnp.float32)
                / jnp.sqrt(fan_in)).astype(dtype)

    def bvec(nout):
        return (0.01 * jax.random.normal(next(ks), (nout,), jnp.float32)).astype(dtype)

    return {
        "proj_w": w((dim_in, d_model)), "proj_b": bvec(d_model),
        "wq": w((d_model, d_model)), "bq": bvec(d_model),
        "wk": w((d_model, d_model)), "bk": bvec(d_model),
        "wv": w((d_model, d_model)), "bv": bvec(d_model),
        "wo": w((d_model, d_model)), "bo": bvec(d_model),
        "w1": w((d_model, dim_feedforward)), "b1": bvec(dim_feedforward),
        "w2": w((dim_feedforward, d_model)), "b2": bvec(d_model),
        "ln1_g": jnp.ones((d_model,), dtype), "ln1_b": jnp.zeros((d_model,), dtype),
        "ln2_g": jnp.ones((d_model,), dtype), "ln2_b": jnp.zeros((d_model,), dtype),
    }


if __name__ == "__main__":
    S, B, D_MODEL, NHEAD, D_FF = 8, 2, 32, 4, 64
    DIM_IN = D_MODEL  # mode='fixed', all *_cat_in_encoder flags off

    key = jax.random.PRNGKey(0)
    k_src, k_par = jax.random.split(key)
    src = jax.random.normal(k_src, (S, B, DIM_IN), jnp.float32)
    params = init_params(k_par, DIM_IN, D_MODEL, D_FF)

    out = transformer_encoder_layer_forward(src, params, nhead=NHEAD)
    out = jax.block_until_ready(out)

    assert out.shape == (S, B, D_MODEL)
    assert bool(jnp.all(jnp.isfinite(out)))

    ref = reference_forward(src, params, nhead=NHEAD)
    assert bool(jnp.allclose(out, ref, rtol=2e-2, atol=2e-2)), (
        "max abs err = %g" % float(jnp.max(jnp.abs(out - ref))))

    print("KERNEL_OK")
</pallas_src>

<mosaic_0001>
module attributes {stable_mosaic.version = 11 : i64} {
  func.func @_proj_qkv_kernel(%arg0: i32, %arg1: memref<16x32xf32, #tpu.memory_space<vmem>>, %arg2: memref<32x32xf32, #tpu.memory_space<vmem>>, %arg3: memref<1x32xf32, #tpu.memory_space<vmem>>, %arg4: memref<32x96xf32, #tpu.memory_space<vmem>>, %arg5: memref<1x96xf32, #tpu.memory_space<vmem>>, %arg6: memref<16x32xf32, #tpu.memory_space<vmem>>, %arg7: memref<16x32xf32, #tpu.memory_space<vmem>>, %arg8: memref<16x32xf32, #tpu.memory_space<vmem>>, %arg9: memref<16x32xf32, #tpu.memory_space<vmem>>) attributes {dimension_semantics = [#tpu.dimension_semantics<parallel>], iteration_bounds = array<i64: 1>, scalar_prefetch = 0 : i64, scratch_operands = 0 : i64, tpu.core_type = #tpu.core_type<tc>, window_params = [{transform_indices = @transform_0, window_bounds = array<i64: 16, 32>}, {pipeline_mode = #tpu.pipeline_mode<synchronous>, transform_indices = @transform_1, window_bounds = array<i64: 32, 32>}, {pipeline_mode = #tpu.pipeline_mode<synchronous>, transform_indices = @transform_2, window_bounds = array<i64: 1, 32>}, {pipeline_mode = #tpu.pipeline_mode<synchronous>, transform_indices = @transform_3, window_bounds = array<i64: 32, 96>}, {pipeline_mode = #tpu.pipeline_mode<synchronous>, transform_indices = @transform_4, window_bounds = array<i64: 1, 96>}, {transform_indices = @transform_5, window_bounds = array<i64: 16, 32>}, {transform_indices = @transform_6, window_bounds = array<i64: 16, 32>}, {transform_indices = @transform_7, window_bounds = array<i64: 16, 32>}, {transform_indices = @transform_8, window_bounds = array<i64: 16, 32>}]} {
    %c0 = arith.constant 0 : index
    %c0_0 = arith.constant 0 : index
    %0 = vector.load %arg1[%c0, %c0_0] : memref<16x32xf32, #tpu.memory_space<vmem>>, vector<16x32xf32>
    %c0_1 = arith.constant 0 : index
    %c0_2 = arith.constant 0 : index
    %1 = vector.load %arg2[%c0_1, %c0_2] : memref<32x32xf32, #tpu.memory_space<vmem>>, vector<32x32xf32>
    %cst = arith.constant dense<0.000000e+00> : vector<16x32xf32>
    %2 = tpu.matmul %0, %1, %cst {dimension_numbers = #tpu.dot_dimension_numbers<[1], [0], [0], [1], [0, 0, 1, 1], [], []>} : vector<16x32xf32>, vector<32x32xf32>, vector<16x32xf32> -> vector<16x32xf32>
    %c0_3 = arith.constant 0 : index
    %c0_4 = arith.constant 0 : index
    %3 = vector.load %arg3[%c0_3, %c0_4] : memref<1x32xf32, #tpu.memory_space<vmem>>, vector<1x32xf32>
    %4 = vector.broadcast %3 : vector<1x32xf32> to vector<16x32xf32>
    %5 = arith.addf %2, %4 : vector<16x32xf32>
    %c0_5 = arith.constant 0 : index
    %c0_6 = arith.constant 0 : index
    %6 = vector.load %arg6[%c0_5, %c0_6] : memref<16x32xf32, #tpu.memory_space<vmem>>, vector<16x32xf32>
    tpu.vector_store %arg6[%c0_5, %c0_6], %5 {strides = array<i32>} : memref<16x32xf32, #tpu.memory_space<vmem>>, vector<16x32xf32>,
    %c0_7 = arith.constant 0 : index
    %c0_8 = arith.constant 0 : index
    %7 = vector.load %arg4[%c0_7, %c0_8] : memref<32x96xf32, #tpu.memory_space<vmem>>, vector<32x96xf32>
    %cst_9 = arith.constant dense<0.000000e+00> : vector<16x96xf32>
    %8 = tpu.matmul %5, %7, %cst_9 {dimension_numbers = #tpu.dot_dimension_numbers<[1], [0], [0], [1], [0, 0, 1, 1], [], []>} : vector<16x32xf32>, vector<32x96xf32>, vector<16x96xf32> -> vector<16x96xf32>
    %c0_10 = arith.constant 0 : index
    %c0_11 = arith.constant 0 : index
    %9 = vector.load %arg5[%c0_10, %c0_11] : memref<1x96xf32, #tpu.memory_space<vmem>>, vector<1x96xf32>
    %10 = vector.broadcast %9 : vector<1x96xf32> to vector<16x96xf32>
    %11 = arith.addf %8, %10 : vector<16x96xf32>
    %12 = vector.extract_strided_slice %11 {offsets = [0, 0], sizes = [16, 32], strides = [1, 1]} : vector<16x96xf32> to vector<16x32xf32>
    %c0_12 = arith.constant 0 : index
    %c0_13 = arith.constant 0 : index
    %13 = vector.load %arg7[%c0_12, %c0_13] : memref<16x32xf32, #tpu.memory_space<vmem>>, vector<16x32xf32>
    tpu.vector_store %arg7[%c0_12, %c0_13], %12 {strides = array<i32>} : memref<16x32xf32, #tpu.memory_space<vmem>>, vector<16x32xf32>,
    %14 = vector.extract_strided_slice %11 {offsets = [0, 32], sizes = [16, 32], strides = [1, 1]} : vector<16x96xf32> to vector<16x32xf32>
    %c0_14 = arith.constant 0 : index
    %c0_15 = arith.constant 0 : index
    %15 = vector.load %arg8[%c0_14, %c0_15] : memref<16x32xf32, #tpu.memory_space<vmem>>, vector<16x32xf32>
    tpu.vector_store %arg8[%c0_14, %c0_15], %14 {strides = array<i32>} : memref<16x32xf32, #tpu.memory_space<vmem>>, vector<16x32xf32>,
    %16 = vector.extract_strided_slice %11 {offsets = [0, 64], sizes = [16, 32], strides = [1, 1]} : vector<16x96xf32> to vector<16x32xf32>
    %c0_16 = arith.constant 0 : index
    %c0_17 = arith.constant 0 : index
    %17 = vector.load %arg9[%c0_16, %c0_17] : memref<16x32xf32, #tpu.memory_space<vmem>>, vector<16x32xf32>
    tpu.vector_store %arg9[%c0_16, %c0_17], %16 {strides = array<i32>} : memref<16x32xf32, #tpu.memory_space<vmem>>, vector<16x32xf32>,
    return
  }
  func.func @transform_0(%arg0: i32) -> (i32, i32) {
    %c0_i32 = arith.constant 0 : i32
    %c0_i32_0 = arith.constant 0 : i32
    return %arg0, %c0_i32 : i32, i32
  }
  func.func @transform_1(%arg0: i32) -> (i32, i32) {
    %c0_i32 = arith.constant 0 : i32
    %c0_i32_0 = arith.constant 0 : i32
    %c0_i32_1 = arith.constant 0 : i32
    return %c0_i32, %c0_i32_0 : i32, i32
  }
  func.func @transform_2(%arg0: i32) -> (i32, i32) {
    %c0_i32 = arith.constant 0 : i32
    %c0_i32_0 = arith.constant 0 : i32
    %c0_i32_1 = arith.constant 0 : i32
    return %c0_i32, %c0_i32_0 : i32, i32
  }
  func.func @transform_3(%arg0: i32) -> (i32, i32) {
    %c0_i32 = arith.constant 0 : i32
    %c0_i32_0 = arith.constant 0 : i32
    %c0_i32_1 = arith.constant 0 : i32
    return %c0_i32, %c0_i32_0 : i32, i32
  }
  func.func @transform_4(%arg0: i32) -> (i32, i32) {
    %c0_i32 = arith.constant 0 : i32
    %c0_i32_0 = arith.constant 0 : i32
    %c0_i32_1 = arith.constant 0 : i32
    return %c0_i32, %c0_i32_0 : i32, i32
  }
  func.func @transform_5(%arg0: i32) -> (i32, i32) {
    %c0_i32 = arith.constant 0 : i32
    %c0_i32_0 = arith.constant 0 : i32
    return %arg0, %c0_i32 : i32, i32
  }
  func.func @transform_6(%arg0: i32) -> (i32, i32) {
    %c0_i32 = arith.constant 0 : i32
    %c0_i32_0 = arith.constant 0 : i32
    return %arg0, %c0_i32 : i32, i32
  }
  func.func @transform_7(%arg0: i32) -> (i32, i32) {
    %c0_i32 = arith.constant 0 : i32
    %c0_i32_0 = arith.constant 0 : i32
    return %arg0, %c0_i32 : i32, i32
  }
  func.func @transform_8(%arg0: i32) -> (i32, i32) {
    %c0_i32 = arith.constant 0 : i32
    %c0_i32_0 = arith.constant 0 : i32
    return %arg0, %c0_i32 : i32, i32
  }
}

</mosaic_0001>

<bundles_post_ra>
// kernel: tpu_custom_call.1
= control target key start
LH: loop header
LB: loop body
LE: loop exit
PB: predicated region body
PF: predicated region fallthrough
CT: control target
= control target key end

     0   :  { %14 = vsyncpa [#allocation3], 0  ;;  %s766_s0 = inlined_call_operand.hbm [shape: f32[16,32], index: 0, kind: input, shape index: {}]   ;;  %s767_s1 = inlined_call_operand.hbm [shape: f32[32,32], index: 1, kind: input, shape index: {}]   ;;  %s768_s2 = inlined_call_operand.vmem [shape: f32[1,32], index: 2, kind: input, shape index: {}]   ;;  %s769_s3 = inlined_call_operand.hbm [shape: f32[32,96], index: 3, kind: input, shape index: {}]   ;;  %s770_s4 = inlined_call_operand.vmem [shape: f32[1,96], index: 4, kind: input, shape index: {}]   ;;  %s771_s5 = inlined_call_operand.hbm [shape: f32[16,32], index: 5, kind: output, shape index: {0}]   ;;  %s772_s6 = inlined_call_operand.hbm [shape: f32[16,32], index: 6, kind: output, shape index: {1}]   ;;  %s773_s7 = inlined_call_operand.hbm [shape: f32[16,32], index: 7, kind: output, shape index: {2}]   ;;  %s774_s8 = inlined_call_operand.hbm [shape: f32[16,32], index: 8, kind: output, shape index: {3}]  }
   0x1   :  { %15 = vsyncpa [#allocation6], 0 }
   0x2   :  { %16 = vsyncpa [#allocation4], 0 }
   0x3   :  { %17 = vsyncpa [#allocation10], 0 }
   0x4   :  { %18 = vsyncpa [#allocation13], 0  ;;  %s573_s27 = smov [#allocation5]   ;;  %s574_s29 = smov [#allocation2]  }
   0x5   :  { %s36_s28 = sshll.u32 %s573_s27, 4  ;;  %s24_s30 = sshll.u32 %s574_s29, 4  ;;  %s37_s28 = int_to_ptr.vmem [resolvable:$true] %s36_s28  ;;  %s629_s30 = int_to_ptr.vmem [resolvable:$true] %s24_s30 }
   0x6   :  { %s409_s11 = scalar_lea.hbm %s767_s1, 512 }
   0x7   :  { %p410_p0 = scmp.ne.s32.totalorder %s767_s1, %s409_s11  ;;  %p413_p1 = scmp.lt.u32.totalorder %s409_s11, %s767_s1 }
   0x9   :  { %p415_p2 = pnand %p413_p1, %p410_p0 }
   0xb   :  { %418 = shalt.err (!%p415_p2)
}
   0xc   :  { %s419_s16 = scalar_lea.vmem %s37_s28, 512  ;;  %p424_p4 = scmp.lt.s32.totalorder %s37_s28, %s37_s28 }
   0xd   :  { %p420_p3 = scmp.ne.s32.totalorder %s37_s28, %s419_s16  ;;  %p425_p5 = scmp.lt.s32.totalorder %s419_s16, %s419_s16 }
   0xf   :  { %p426_p6 = por %p425_p5, %p424_p4 }
  0x11   :  { %p427_p7 = pnand %p426_p6, %p420_p3 }
  0x13   :  { %430 = shalt.err (!%p427_p7)
}
  0x14   :  { %s575_s17 = smov 128   ;;  %s576_s18 = smov 8  }
  0x15   :  { %42 = dma.hbm_to_vmem [thread:$0]  %s767_s1, 512, %s37_s28, [#allocation6], %s575_s17, %s575_s17, %s576_s18  }
  0x16   :  { %s431_s23 = scalar_lea.hbm %s766_s0, 256 }
  0x17   :  { %p432_p8 = scmp.ne.s32.totalorder %s766_s0, %s431_s23  ;;  %p435_p9 = scmp.lt.u32.totalorder %s431_s23, %s766_s0 }
  0x19   :  { %p437_p10 = pnand %p435_p9, %p432_p8 }
  0x1b   :  { %440 = shalt.err (!%p437_p10)
}
  0x1c   :  { %s441_s29 = scalar_lea.vmem %s629_s30, 256  ;;  %p446_p12 = scmp.lt.s32.totalorder %s629_s30, %s629_s30 }
  0x1d   :  { %p442_p11 = scmp.ne.s32.totalorder %s629_s30, %s441_s29  ;;  %p447_p13 = scmp.lt.s32.totalorder %s441_s29, %s441_s29 }
  0x1f   :  { %p448_p0 = por %p447_p13, %p446_p12 }
  0x21   :  { %p449_p1 = pnand %p448_p0, %p442_p11 }
  0x23   :  { %452 = shalt.err (!%p449_p1)
}
  0x24   :  { %30 = dma.hbm_to_vmem [thread:$0]  %s766_s0, 256, %s629_s30, [#allocation3], %s575_s17, %s575_s17, %s576_s18  }
  0x25   :  { %s577_s9 = smov [#allocation7]   ;;  %s453_s13 = scalar_lea.hbm %s769_s3, 512 }
  0x26   :  { %s50_s10 = sshll.u32 %s577_s9, 4  ;;  %p454_p2 = scmp.ne.s32.totalorder %s769_s3, %s453_s13  ;;  %s51_s10 = int_to_ptr.vmem [resolvable:$true] %s50_s10 }
  0x27   :  { %p457_p3 = scmp.lt.u32.totalorder %s453_s13, %s769_s3 }
  0x29   :  { %p459_p4 = pnand %p457_p3, %p454_p2 }
  0x2b   :  { %462 = shalt.err (!%p459_p4)
}
  0x2c   :  { %s463_s20 = scalar_lea.vmem %s51_s10, 512  ;;  %p468_p6 = scmp.lt.s32.totalorder %s51_s10, %s51_s10 }
  0x2d   :  { %p464_p5 = scmp.ne.s32.totalorder %s51_s10, %s463_s20  ;;  %p469_p7 = scmp.lt.s32.totalorder %s463_s20, %s463_s20 }
  0x2f   :  { %p470_p8 = por %p469_p7, %p468_p6 }
  0x31   :  { %p471_p9 = pnand %p470_p8, %p464_p5 }
  0x33   :  { %474 = shalt.err (!%p471_p9)
}
  0x34   :  { %56 = dma.hbm_to_vmem [thread:$0]  %s769_s3, 512, %s51_s10, [#allocation6], %s575_s17, %s575_s17, %s576_s18  }
  0x35   :  { %563 = dma.done.wait [#allocation3], 256  }
  0x36   :  { %564 = vsyncadd [#allocation3], 4294967040 }
  0x37   :  { %565 = dma.done.wait [#allocation6], 1024  }
  0x38   :  { %566 = vsyncadd [#allocation6], 4294966272  ;;  %vm81_vm0 = vcmask 261120   ;;  %v70_v0 = vld [vmem:[#allocation5] sm:$0xff]  ;;  %v71_v1 = vld [vmem:[#allocation5 + $0x8] sm:$0xff]  ;;  %s578_s22 = smov [#allocation8]  }
  0x39   :  { %v72_v2 = vld [vmem:[#allocation5 + $0x10] sm:$0xff]  ;;  %v382_v3 = vpack.c.bf16 %v71_v1, %v70_v0  ;;  %v73_v4 = vld [vmem:[#allocation5 + $0x18] sm:$0xff]  ;;  %v165_v7 = vld [vmem:[#allocation7] sm:$0xff]  ;;  %s282_s23 = sshll.u32 %s578_s22, 4  ;;  %s283_s23 = int_to_ptr.vmem [resolvable:$true] %s282_s23 }
  0x3a   :  { %v68_v5 = vld [vmem:[#allocation2] sm:$0xff]  ;;  %v386_v6 = vpack.c.bf16 %v73_v4, %v72_v2  ;;  %v166_v8 = vld [vmem:[#allocation7 + $0x8] sm:$0xff]  ;;  %v69_v10 = vld [vmem:[#allocation2 + $0x8] sm:$0xff]  ;;  %s475_s24 = scalar_lea.vmem %s283_s23, 256  ;;  %p480_p11 = scmp.lt.s32.totalorder %s283_s23, %s283_s23 }
  0x3b   :  { %368 = vmatprep.mubr.msk.f32.mxu0 %vm81_vm0, %v68_v5  ;;  %383 = vmatprep.subr.bf16.mxu0 %v382_v3  ;;  %v390_v9 = vpack.c.bf16 %v166_v8, %v165_v7  ;;  %v167_v11 = vld [vmem:[#allocation7 + $0x10] sm:$0xff]  ;;  %v168_v12 = vld [vmem:[#allocation7 + $0x18] sm:$0xff]  ;;  %p476_p10 = scmp.ne.s32.totalorder %s283_s23, %s475_s24  ;;  %p481_p12 = scmp.lt.s32.totalorder %s475_s24, %s475_s24 }
  0x3c   :  { %385 = vmatpush3.bf16.msra.mxu0 %v382_v3  ;;  %v394_v13 = vpack.c.bf16 %v168_v12, %v167_v11  ;;  %v342_v14 = vld [vmem:[%s768_s2] ss:$0 sm:$0xff] }
  0x3d   :  { %387 = vmatprep.subr.bf16.mxu0 %v386_v6  ;;  %391 = vmatprep.subr.bf16.mxu1 %v390_v9  ;;  %p482_p13 = por %p481_p12, %p480_p11 }
  0x3e   :  { %393 = vmatpush3.bf16.msra.mxu1 %v390_v9 }
  0x3f   :  { %395 = vmatprep.subr.bf16.mxu1 %v394_v13  ;;  %p483_p0 = pnand %p482_p13, %p476_p10 }
  0x40   :  { %389 = vmatpush3.bf16.msra.mxu0 %v386_v6 }
  0x42   :  { %397 = vmatpush3.bf16.msra.mxu1 %v394_v13 }
  0x43   :  { %369 = vmatmul.mubr.msk.f32.vlgmr.msra.gmra.mrb[0].mxu0 %vm81_vm0, %v69_v10 }
 0x116   :  { %v370_v15 = vpop.f32.mrb[0].mxu0 }
 0x117   :  { %v160_v16 = vadd.f32 %v370_v15, %v342_v14  ;;  %v154_v17 = vpop.f32.mrb[1].mxu0 }
 0x118   :  { %v155_v18 = vadd.f32 %v342_v14, %v154_v17 }
 0x119   :  { %164 = vst.msk [vmem:[#allocation8 + $0x8] sm:$0xff] %vm81_vm0, %v160_v16 }
 0x11a   :  { %163 = vst.msk [vmem:[#allocation8] sm:$0xff] %vm81_vm0, %v155_v18  ;;  %379 = vmatprep.mubr.msk.f32.mxu1 %vm81_vm0, %v155_v18 }
 0x11b   :  { %380 = vmatmul.mubr.msk.f32.vlgmr.msra.gmra.mrb[0].mxu1 %vm81_vm0, %v160_v16 }
 0x11c   :  { %486 = shalt.err (!%p483_p0)
}
 0x11d   :  { %s487_s26 = scalar_lea.hbm %s771_s5, 256 }
 0x11e   :  { %p488_p1 = scmp.ne.s32.totalorder %s771_s5, %s487_s26  ;;  %p491_p2 = scmp.lt.u32.totalorder %s487_s26, %s771_s5 }
 0x120   :  { %p493_p3 = pnand %p491_p2, %p488_p1 }
 0x122   :  { %496 = shalt.err (!%p493_p3)
}
 0x123   :  { %288 = dma.vmem_to_hbm [thread:$0]  %s283_s23, 256, %s771_s5, [#allocation4], %s575_s17, %s575_s17, %s576_s18  }
 0x124   :  { %v345_v19 = vld [vmem:[%s770_s4] ss:$0 sm:$0xff]  ;;  %s579_s13 = smov [#allocation9]   ;;  %s580_s15 = smov 64  }
 0x125   :  { %s294_s14 = sshll.u32 %s579_s13, 4  ;;  %s581_s16 = smov 96   ;;  %s295_s14 = int_to_ptr.vmem [resolvable:$true] %s294_s14 }
 0x126   :  { %s497_s5 = scalar_lea.vmem %s295_s14, 256  ;;  %p502_p5 = scmp.lt.s32.totalorder %s295_s14, %s295_s14 }
 0x127   :  { %p498_p4 = scmp.ne.s32.totalorder %s295_s14, %s497_s5  ;;  %p503_p6 = scmp.lt.s32.totalorder %s497_s5, %s497_s5 }
 0x129   :  { %p504_p7 = por %p503_p6, %p502_p5 }
 0x12b   :  { %p505_p8 = pnand %p504_p7, %p498_p4 }
 0x1ee   :  { %v381_v20 = vpop.f32.mrb[0].mxu1 }
 0x1ef   :  { %v254_v21 = vadd.f32 %v381_v20, %v345_v19  ;;  %v248_v22 = vpop.f32.mrb[1].mxu1 }
 0x1f0   :  { %v249_v23 = vadd.f32 %v345_v19, %v248_v22 }
 0x1f1   :  { %258 = vst.msk [vmem:[#allocation9 + $0x8] sm:$0xff] %vm81_vm0, %v254_v21 }
 0x1f2   :  { %257 = vst.msk [vmem:[#allocation9] sm:$0xff] %vm81_vm0, %v249_v23  ;;  %269 = vrot.lane.b32.xlu1 %v249_v23, %s580_s15  ;;  %261 = vrot.lane.b32.xlu0 %v249_v23, %s581_s16 }
 0x1f3   :  { %508 = shalt.err (!%p505_p8)
}
 0x1f4   :  { %s509_s20 = scalar_lea.hbm %s772_s6, 256 }
 0x1f5   :  { %p510_p9 = scmp.ne.s32.totalorder %s772_s6, %s509_s20  ;;  %p513_p10 = scmp.lt.u32.totalorder %s509_s20, %s772_s6 }
 0x1f7   :  { %p515_p11 = pnand %p513_p10, %p510_p9 }
 0x1f9   :  { %518 = shalt.err (!%p515_p11)
}
 0x1fa   :  { %300 = dma.vmem_to_hbm [thread:$0]  %s295_s14, 256, %s772_s6, [#allocation10], %s575_s17, %s575_s17, %s576_s18  }
 0x1fb   :  { %271 = vrot.lane.b32.xlu1 %v254_v21, %s580_s15  ;;  %263 = vrot.lane.b32.xlu0 %v254_v21, %s581_s16  ;;  %s582_s24 = smov [#allocation11]   ;;  %s583_s25 = smov [#allocation12]  }
 0x1fc   :  { %s306_s2 = sshll.u32 %s582_s24, 4  ;;  %s318_s26 = sshll.u32 %s583_s25, 4  ;;  %s307_s2 = int_to_ptr.vmem [resolvable:$true] %s306_s2  ;;  %s727_s26 = int_to_ptr.vmem [resolvable:$true] %s318_s26 }
 0x1fd   :  { %s519_s6 = scalar_lea.vmem %s307_s2, 256  ;;  %p524_p13 = scmp.lt.s32.totalorder %s307_s2, %s307_s2 }
 0x1fe   :  { %p520_p12 = scmp.ne.s32.totalorder %s307_s2, %s519_s6  ;;  %p525_p0 = scmp.lt.s32.totalorder %s519_s6, %s519_s6 }
 0x200   :  { %p526_p1 = por %p525_p0, %p524_p13 }
 0x202   :  { %p527_p2 = pnand %p526_p1, %p520_p12 }
 0x264   :  { %v270_v24 = vpop.permute.xlu1 %269  ;;  %v262_v25 = vpop.permute.xlu0 %261 }
 0x265   :  { %275 = vst.msk [vmem:[#allocation12] sm:$0xff] %vm81_vm0, %v270_v24  ;;  %267 = vst.msk [vmem:[#allocation11] sm:$0xff] %vm81_vm0, %v262_v25 }
 0x26d   :  { %v272_v26 = vpop.permute.xlu1 %271  ;;  %v264_v27 = vpop.permute.xlu0 %263 }
 0x26e   :  { %276 = vst.msk [vmem:[#allocation12 + $0x8] sm:$0xff] %vm81_vm0, %v272_v26  ;;  %268 = vst.msk [vmem:[#allocation11 + $0x8] sm:$0xff] %vm81_vm0, %v264_v27 }
 0x26f   :  { %530 = shalt.err (!%p527_p2)
}
 0x270   :  { %s531_s1 = scalar_lea.hbm %s773_s7, 256 }
 0x271   :  { %p532_p3 = scmp.ne.s32.totalorder %s773_s7, %s531_s1  ;;  %p535_p4 = scmp.lt.u32.totalorder %s531_s1, %s773_s7 }
 0x273   :  { %p537_p5 = pnand %p535_p4, %p532_p3 }
 0x275   :  { %540 = shalt.err (!%p537_p5)
}
 0x276   :  { %312 = dma.vmem_to_hbm [thread:$0]  %s307_s2, 256, %s773_s7, [#allocation10], %s575_s17, %s575_s17, %s576_s18  }
 0x277   :  { %s541_s14 = scalar_lea.vmem %s727_s26, 256  ;;  %p546_p7 = scmp.lt.s32.totalorder %s727_s26, %s727_s26 }
 0x278   :  { %p542_p6 = scmp.ne.s32.totalorder %s727_s26, %s541_s14  ;;  %p547_p8 = scmp.lt.s32.totalorder %s541_s14, %s541_s14 }
 0x27a   :  { %p548_p9 = por %p547_p8, %p546_p7 }
 0x27c   :  { %p549_p10 = pnand %p548_p9, %p542_p6 }
 0x27e   :  { %552 = shalt.err (!%p549_p10)
}
 0x27f   :  { %s553_s5 = scalar_lea.hbm %s774_s8, 256 }
 0x280   :  { %p554_p11 = scmp.ne.s32.totalorder %s774_s8, %s553_s5  ;;  %p557_p12 = scmp.lt.u32.totalorder %s553_s5, %s774_s8 }
 0x282   :  { %p559_p13 = pnand %p557_p12, %p554_p11 }
 0x284   :  { %562 = shalt.err (!%p559_p13)
}
 0x285   :  { %324 = dma.vmem_to_hbm [thread:$0]  %s727_s26, 256, %s774_s8, [#allocation13], %s575_s17, %s575_s17, %s576_s18  }
 0x286   :  { %567 = dma.done.wait [#allocation4], 256  }
 0x287   :  { %568 = vsyncadd [#allocation4], 4294967040 }
 0x288   :  { %569 = dma.done.wait [#allocation10], 512  }
 0x289   :  { %570 = vsyncadd [#allocation10], 4294966784 }
 0x28a   :  { %571 = dma.done.wait [#allocation13], 256  }
 0x28b   :  { %572 = vsyncadd [#allocation13], 4294967040 }
 0x28c   :  { %337 = vsyncpa [#allocation3], 1 }
 0x28d   :  { %338 = vsyncpa [#allocation6], 1 }
 0x28e   :  { %339 = vsyncpa [#allocation4], 1 }
 0x28f   :  { %340 = vsyncpa [#allocation10], 1 }
 0x290   :  { %341 = vsyncpa [#allocation13], 1 }

</bundles_post_ra>
